<compile_context>
chip_gen: v6e
topology: v6e:2x2x1
jax: 0.10.0
libtpu: 0.0.40
codegen_flags: <defaults>
</compile_context>

<pallas_src>
import math

import jax
import jax.numpy as jnp
from jax import lax
from jax.experimental import pallas as pl
from jax.experimental.pallas import tpu as pltpu


def _disc_kernel(summary_ref, w_ref, h_rl_ref, h_fk_ref, bias_ref,
                 out_ref, z_ref):
    # summary_ref : (B_t, n_h)       batch tile of graph summaries
    # w_ref       : (n_h, n_h)       bilinear weight W[0] (constant block index)
    # h_rl_ref    : (B_t, N_t, n_h)  real node embeddings tile
    # h_fk_ref    : (B_t, N_t, n_h)  corrupted node embeddings tile
    # bias_ref    : (1,)             bilinear bias, SMEM scalar
    # out_ref     : (2, B_t, N_t)    [0] -> real scores, [1] -> fake scores
    # z_ref       : (B_t, n_h)       VMEM scratch, z[b,:] = W @ summary[b,:]
    ni = pl.program_id(1)

    @pl.when(ni == 0)
    def _():
        # z[b, i] = sum_j W[i, j] * summary[b, j]
        # One well-shaped matmul per batch tile; contracting on W's axis 1
        # avoids an in-kernel transpose of W.
        z_ref[...] = lax.dot_general(
            summary_ref[...], w_ref[...],
            dimension_numbers=(((1,), (1,)), ((), ())),
            preferred_element_type=jnp.float32)

    z = z_ref[...][:, None, :]                      # (B_t, 1, n_h)
    bias = bias_ref[0]

    # out=1 bilinear score: VPU multiply + lane (last-axis) reduce -- keeps the
    # MXU out of the per-tile critical path entirely.
    out_ref[0] = jnp.sum(h_rl_ref[...] * z, axis=-1) + bias   # (B_t, N_t)
    out_ref[1] = jnp.sum(h_fk_ref[...] * z, axis=-1) + bias   # (B_t, N_t)


def _pick_n_tile(N, b_tile, n_h):
    # Keep the two double-buffered h blocks within ~16 MiB of VMEM.  Tiles along
    # N must be multiples of 128 (lane width) unless they span the full axis.
    budget_rows = (16 << 20) // (4 * 4 * b_tile * n_h)   # f32, 2 inputs, 2 bufs
    if N <= budget_rows:
        return N
    cand = (budget_rows // 128) * 128
    while cand >= 128 and N % cand != 0:
        cand -= 128
    return cand if cand >= 128 else N


def discriminator_forward(summary, h_rl, h_fk, weight, bias,
                          *, b_tile=None, n_tile=None):
    """summary: (B, n_h); h_rl/h_fk: (B, N, n_h); weight: (n_h, n_h); bias: (1,).

    Returns logits (B, 2N) matching torch.cat((sc_rl, sc_fk), dim=1).
    """
    B, N, n_h = h_rl.shape
    assert summary.shape == (B, n_h)
    assert h_fk.shape == (B, N, n_h)
    assert weight.shape == (n_h, n_h)
    bias = jnp.asarray(bias, dtype=jnp.float32).reshape((1,))

    if b_tile is None:
        # Multiple-of-8 batch tiles fill sublanes; otherwise take the full axis.
        b_tile = 8 if (B % 8 == 0) else B
    if n_tile is None:
        n_tile = _pick_n_tile(N, b_tile, n_h)
    assert B % b_tile == 0 and N % n_tile == 0

    grid = (B // b_tile, N // n_tile)

    out = pl.pallas_call(
        _disc_kernel,
        out_shape=jax.ShapeDtypeStruct((2, B, N), jnp.float32),
        grid_spec=pltpu.PrefetchScalarGridSpec(
            num_scalar_prefetch=0,
            grid=grid,
            in_specs=[
                pl.BlockSpec((b_tile, n_h), lambda b, n: (b, 0)),
                pl.BlockSpec((n_h, n_h), lambda b, n: (0, 0)),
                pl.BlockSpec((b_tile, n_tile, n_h), lambda b, n: (b, n, 0)),
                pl.BlockSpec((b_tile, n_tile, n_h), lambda b, n: (b, n, 0)),
                pl.BlockSpec(memory_space=pltpu.MemorySpace.SMEM),
            ],
            out_specs=pl.BlockSpec((2, b_tile, n_tile), lambda b, n: (0, b, n)),
            scratch_shapes=[pltpu.VMEM((b_tile, n_h), jnp.float32)],
        ),
        compiler_params=pltpu.CompilerParams(
            # Batch tiles are independent (megacore-shardable); N tiles reuse
            # the per-batch z scratch so they stay sequential.
            dimension_semantics=("parallel", "arbitrary")),
    )(summary, weight, h_rl, h_fk, bias)

    # (2, B, N) -> (B, 2N): first N cols = real, last N = fake (== torch.cat).
    return jnp.concatenate((out[0], out[1]), axis=1)


def _reference_forward(summary, h_rl, h_fk, weight, bias):
    # Pure-JAX reference of the bilinear discriminator.
    z = jnp.einsum("ij,bj->bi", weight, summary)              # (B, n_h)
    sc_rl = jnp.einsum("bni,bi->bn", h_rl, z) + bias[0]       # (B, N)
    sc_fk = jnp.einsum("bni,bi->bn", h_fk, z) + bias[0]       # (B, N)
    return jnp.concatenate([sc_rl, sc_fk], axis=1)


if __name__ == "__main__":
    B, N, n_h = 2, 8, 32

    key = jax.random.PRNGKey(0)
    k_sum, k_rl, k_fk, k_w = jax.random.split(key, 4)

    summary = jax.random.normal(k_sum, (B, n_h), dtype=jnp.float32)
    h_rl = jax.random.normal(k_rl, (B, N, n_h), dtype=jnp.float32)
    h_fk = jax.random.normal(k_fk, (B, N, n_h), dtype=jnp.float32)

    # nn.Bilinear(n_h, n_h, 1) weight shape (1, n_h, n_h); xavier_uniform_:
    # fan_in = n_h * n_h, fan_out = 1 * n_h, bound = sqrt(6 / (fan_in + fan_out))
    bound = math.sqrt(6.0 / (n_h * n_h + n_h))
    weight = jax.random.uniform(
        k_w, (n_h, n_h), minval=-bound, maxval=bound, dtype=jnp.float32)
    bias = jnp.zeros((1,), dtype=jnp.float32)                 # bias.data.fill_(0.0)

    logits = discriminator_forward(summary, h_rl, h_fk, weight, bias)
    logits = jax.block_until_ready(logits)

    ref = _reference_forward(summary, h_rl, h_fk, weight, bias)
    assert logits.shape == (B, 2 * N), logits.shape
    assert jnp.allclose(logits, ref, atol=1e-4, rtol=1e-4), (
        jnp.max(jnp.abs(logits - ref)))

    print("KERNEL_OK")
</pallas_src>

<mosaic_0001>
module attributes {stable_mosaic.version = 11 : i64} {
  func.func @_disc_kernel(%arg0: i32, %arg1: i32, %arg2: memref<2x32xf32, #tpu.memory_space<vmem>>, %arg3: memref<32x32xf32, #tpu.memory_space<vmem>>, %arg4: memref<2x8x32xf32, #tpu.memory_space<vmem>>, %arg5: memref<2x8x32xf32, #tpu.memory_space<vmem>>, %arg6: memref<1xf32, #tpu.memory_space<smem>>, %arg7: memref<2x2x8xf32, #tpu.memory_space<vmem>>, %arg8: memref<2x32xf32, #tpu.memory_space<vmem>>) attributes {dimension_semantics = [#tpu.dimension_semantics<parallel>, #tpu.dimension_semantics<arbitrary>], iteration_bounds = array<i64: 1, 1>, scalar_prefetch = 0 : i64, scratch_operands = 1 : i64, tpu.core_type = #tpu.core_type<tc>, window_params = [{transform_indices = @transform_0, window_bounds = array<i64: 2, 32>}, {pipeline_mode = #tpu.pipeline_mode<synchronous>, transform_indices = @transform_1, window_bounds = array<i64: 32, 32>}, {transform_indices = @transform_2, window_bounds = array<i64: 2, 8, 32>}, {transform_indices = @transform_3, window_bounds = array<i64: 2, 8, 32>}, {transform_indices = @transform_4, window_bounds = array<i64: 1>}, {transform_indices = @transform_5, window_bounds = array<i64: 2, 2, 8>}]} {
    %c0_i32 = arith.constant 0 : i32
    %0 = arith.cmpi eq, %arg1, %c0_i32 : i32
    %1 = arith.extui %0 : i1 to i32
    %c0_i32_0 = arith.constant 0 : i32
    %2 = arith.cmpi ne, %1, %c0_i32_0 : i32
    scf.if %2 {
      %c0_15 = arith.constant 0 : index
      %c0_16 = arith.constant 0 : index
      %24 = vector.load %arg2[%c0_15, %c0_16] : memref<2x32xf32, #tpu.memory_space<vmem>>, vector<2x32xf32>
      %c0_17 = arith.constant 0 : index
      %c0_18 = arith.constant 0 : index
      %25 = vector.load %arg3[%c0_17, %c0_18] : memref<32x32xf32, #tpu.memory_space<vmem>>, vector<32x32xf32>
      %cst_19 = arith.constant dense<0.000000e+00> : vector<2x32xf32>
      %26 = tpu.matmul %24, %25, %cst_19 {dimension_numbers = #tpu.dot_dimension_numbers<[1], [1], [0], [0], [0, 0, 1, 0], [], []>} : vector<2x32xf32>, vector<32x32xf32>, vector<2x32xf32> -> vector<2x32xf32>
      %c0_20 = arith.constant 0 : index
      %c0_21 = arith.constant 0 : index
      %27 = vector.load %arg8[%c0_20, %c0_21] : memref<2x32xf32, #tpu.memory_space<vmem>>, vector<2x32xf32>
      tpu.vector_store %arg8[%c0_20, %c0_21], %26 {strides = array<i32>} : memref<2x32xf32, #tpu.memory_space<vmem>>, vector<2x32xf32>,
    } else {
    }
    %c0 = arith.constant 0 : index
    %c0_1 = arith.constant 0 : index
    %3 = vector.load %arg8[%c0, %c0_1] : memref<2x32xf32, #tpu.memory_space<vmem>>, vector<2x32xf32>
    %4 = vector.shape_cast %3 : vector<2x32xf32> to vector<2x1x32xf32>
    %c0_2 = arith.constant 0 : index
    %5 = memref.load %arg6[%c0_2] : memref<1xf32, #tpu.memory_space<smem>>
    %c0_3 = arith.constant 0 : index
    %c0_4 = arith.constant 0 : index
    %c0_5 = arith.constant 0 : index
    %6 = vector.load %arg4[%c0_3, %c0_4, %c0_5] : memref<2x8x32xf32, #tpu.memory_space<vmem>>, vector<2x8x32xf32>
    %7 = vector.broadcast %4 : vector<2x1x32xf32> to vector<2x8x32xf32>
    %8 = arith.mulf %6, %7 : vector<2x8x32xf32>
    %cst = arith.constant dense<0.000000e+00> : vector<2x8xf32>
    %9 = vector.multi_reduction <add>, %8, %cst [2] : vector<2x8x32xf32> to vector<2x8xf32>
    %10 = vector.broadcast %5 : f32 to vector<2x8xf32>
    %11 = arith.addf %9, %10 : vector<2x8xf32>
    %c0_6 = arith.constant 0 : index
    %c0_7 = arith.constant 0 : index
    %c0_8 = arith.constant 0 : index
    %12 = vector.load %arg7[%c0_6, %c0_7, %c0_8] : memref<2x2x8xf32, #tpu.memory_space<vmem>>, vector<1x2x8xf32>
    %13 = vector.shape_cast %12 : vector<1x2x8xf32> to vector<2x8xf32>
    %14 = vector.shape_cast %11 : vector<2x8xf32> to vector<1x2x8xf32>
    tpu.vector_store %arg7[%c0_6, %c0_7, %c0_8], %14 {strides = array<i32>} : memref<2x2x8xf32, #tpu.memory_space<vmem>>, vector<1x2x8xf32>,
    %c0_9 = arith.constant 0 : index
    %c0_10 = arith.constant 0 : index
    %c0_11 = arith.constant 0 : index
    %15 = vector.load %arg5[%c0_9, %c0_10, %c0_11] : memref<2x8x32xf32, #tpu.memory_space<vmem>>, vector<2x8x32xf32>
    %16 = vector.broadcast %4 : vector<2x1x32xf32> to vector<2x8x32xf32>
    %17 = arith.mulf %15, %16 : vector<2x8x32xf32>
    %cst_12 = arith.constant dense<0.000000e+00> : vector<2x8xf32>
    %18 = vector.multi_reduction <add>, %17, %cst_12 [2] : vector<2x8x32xf32> to vector<2x8xf32>
    %19 = vector.broadcast %5 : f32 to vector<2x8xf32>
    %20 = arith.addf %18, %19 : vector<2x8xf32>
    %c1 = arith.constant 1 : index
    %c0_13 = arith.constant 0 : index
    %c0_14 = arith.constant 0 : index
    %21 = vector.load %arg7[%c1, %c0_13, %c0_14] : memref<2x2x8xf32, #tpu.memory_space<vmem>>, vector<1x2x8xf32>
    %22 = vector.shape_cast %21 : vector<1x2x8xf32> to vector<2x8xf32>
    %23 = vector.shape_cast %20 : vector<2x8xf32> to vector<1x2x8xf32>
    tpu.vector_store %arg7[%c1, %c0_13, %c0_14], %23 {strides = array<i32>} : memref<2x2x8xf32, #tpu.memory_space<vmem>>, vector<1x2x8xf32>,
    return
  }
  func.func @transform_0(%arg0: i32, %arg1: i32) -> (i32, i32) {
    %c0_i32 = arith.constant 0 : i32
    %c0_i32_0 = arith.constant 0 : i32
    return %arg0, %c0_i32 : i32, i32
  }
  func.func @transform_1(%arg0: i32, %arg1: i32) -> (i32, i32) {
    %c0_i32 = arith.constant 0 : i32
    %c0_i32_0 = arith.constant 0 : i32
    %c0_i32_1 = arith.constant 0 : i32
    return %c0_i32, %c0_i32_0 : i32, i32
  }
  func.func @transform_2(%arg0: i32, %arg1: i32) -> (i32, i32, i32) {
    %c0_i32 = arith.constant 0 : i32
    %c0_i32_0 = arith.constant 0 : i32
    return %arg0, %arg1, %c0_i32 : i32, i32, i32
  }
  func.func @transform_3(%arg0: i32, %arg1: i32) -> (i32, i32, i32) {
    %c0_i32 = arith.constant 0 : i32
    %c0_i32_0 = arith.constant 0 : i32
    return %arg0, %arg1, %c0_i32 : i32, i32, i32
  }
  func.func @transform_4(%arg0: i32, %arg1: i32) -> i32 {
    %c0_i32 = arith.constant 0 : i32
    %c0_i32_0 = arith.constant 0 : i32
    return %c0_i32 : i32
  }
  func.func @transform_5(%arg0: i32, %arg1: i32) -> (i32, i32, i32) {
    %c0_i32 = arith.constant 0 : i32
    %c0_i32_0 = arith.constant 0 : i32
    return %c0_i32, %arg0, %arg1 : i32, i32, i32
  }
}

</mosaic_0001>

<bundles_post_ra>
// kernel: tpu_custom_call.1
= control target key start
LH: loop header
LB: loop body
LE: loop exit
PB: predicated region body
PF: predicated region fallthrough
CT: control target
= control target key end

     0   :  { %11 = vsyncpa [#allocation5], 0  ;;  %s457_s0 = inlined_call_operand.vmem [shape: f32[2,32], index: 0, kind: input, shape index: {}]   ;;  %s458_s1 = inlined_call_operand.hbm [shape: f32[32,32], index: 1, kind: input, shape index: {}]   ;;  %s459_s2 = inlined_call_operand.hbm [shape: f32[2,8,32], index: 2, kind: input, shape index: {}]   ;;  %s460_s3 = inlined_call_operand.hbm [shape: f32[2,8,32], index: 3, kind: input, shape index: {}]   ;;  %s461_s4 = inlined_call_operand.<no memory space> [shape: f32[1], index: 4, kind: input, shape index: {}]   ;;  %s462_s5 = inlined_call_operand.hbm [shape: f32[2,2,8], index: 5, kind: output, shape index: {}]  }
   0x1   :  { %12 = vsyncpa [#allocation8], 0 }
   0x2   :  { %13 = vsyncpa [#allocation6], 0  ;;  %s389_s18 = smov [#allocation7]   ;;  %s390_s20 = smov [#allocation4]  }
   0x3   :  { %s33_s19 = sshll.u32 %s389_s18, 4  ;;  %s21_s21 = sshll.u32 %s390_s20, 4  ;;  %s34_s19 = int_to_ptr.vmem [resolvable:$true] %s33_s19  ;;  %s22_s21 = int_to_ptr.vmem [resolvable:$true] %s21_s21 }
   0x4   :  { %s311_s22 = scalar_lea.vmem %s34_s19, 256  ;;  %p316_p1 = scmp.lt.s32.totalorder %s34_s19, %s34_s19 }
   0x5   :  { %p312_p0 = scmp.ne.s32.totalorder %s34_s19, %s311_s22  ;;  %p317_p2 = scmp.lt.s32.totalorder %s311_s22, %s311_s22 }
   0x7   :  { %p318_p3 = por %p317_p2, %p316_p1 }
   0x9   :  { %p319_p4 = pnand %p318_p3, %p312_p0 }
   0xb   :  { %322 = shalt.err (!%p319_p4)
}
   0xc   :  { %s391_s23 = smov 128   ;;  %s392_s24 = smov 8  }
   0xd   :  { %39 = dma.hbm_to_vmem [thread:$0]  %s459_s2, 256, %s34_s19, [#allocation8], %s391_s23, %s391_s23, %s392_s24  }
   0xe   :  { %s331_s27 = scalar_lea.vmem %s22_s21, 512  ;;  %p336_p6 = scmp.lt.s32.totalorder %s22_s21, %s22_s21 }
   0xf   :  { %p332_p5 = scmp.ne.s32.totalorder %s22_s21, %s331_s27  ;;  %p337_p7 = scmp.lt.s32.totalorder %s331_s27, %s331_s27 }
  0x11   :  { %p338_p8 = por %p337_p7, %p336_p6 }
  0x13   :  { %p339_p9 = pnand %p338_p8, %p332_p5 }
  0x15   :  { %342 = shalt.err (!%p339_p9)
}
  0x16   :  { %27 = dma.hbm_to_vmem [thread:$0]  %s458_s1, 512, %s22_s21, [#allocation5], %s391_s23, %s391_s23, %s392_s24  }
  0x17   :  { %s393_s30 = smov [#allocation9]  }
  0x18   :  { %s45_s6 = sshll.u32 %s393_s30, 4  ;;  %s46_s6 = int_to_ptr.vmem [resolvable:$true] %s45_s6 }
  0x19   :  { %s351_s7 = scalar_lea.vmem %s46_s6, 256  ;;  %p356_p11 = scmp.lt.s32.totalorder %s46_s6, %s46_s6 }
  0x1a   :  { %p352_p10 = scmp.ne.s32.totalorder %s46_s6, %s351_s7  ;;  %p357_p12 = scmp.lt.s32.totalorder %s351_s7, %s351_s7 }
  0x1c   :  { %p358_p13 = por %p357_p12, %p356_p11 }
  0x1e   :  { %p359_p0 = pnand %p358_p13, %p352_p10 }
  0x20   :  { %362 = shalt.err (!%p359_p0)
}
  0x21   :  { %51 = dma.hbm_to_vmem [thread:$0]  %s460_s3, 256, %s46_s6, [#allocation8], %s391_s23, %s391_s23, %s392_s24  }
  0x22   :  { %383 = dma.done.wait [#allocation5], 512  }
  0x23   :  { %384 = vsyncadd [#allocation5], 4294966784 }
  0x24   :  { %385 = dma.done.wait [#allocation8], 512  }
  0x25   :  { %386 = vsyncadd [#allocation8], 4294966784  ;;  %v394_v0 = vmov 0.0   ;;  %vm395_vm0 = vmmov 0   ;;  %vm72_vm1 = vcmask 261120   ;;  %v71_v1 = vld [vmem:[#allocation4 + $0x18] sm:$0xff]  ;;  %v173_v6 = vlaneseq }
  0x26   :  { %281 = vmatprep.subr.mxu0 %v394_v0  ;;  %289 = vmatprep.mubr.msk.f32.mxu0 %vm395_vm0, %v394_v0  ;;  %v70_v2 = vld [vmem:[#allocation4 + $0x10] sm:$0xff]  ;;  %v69_v3 = vld [vmem:[#allocation4 + $0x8] sm:$0xff]  ;;  %v68_v4 = vld [vmem:[#allocation4] sm:$0xff]  ;;  %v396_v10 = vmov 1966171168   ;;  %vm158_vm2 = vcmask 254976   ;;  %v206_v35 = vstv %s461_s4 }
  0x27   :  { %282 = vmatpush3.xpose.msk.msra.mxu0 %vm72_vm1, %v71_v1  ;;  %v67_v5 = vld [vmem:[%s457_s0] sm:$0x3]  ;;  %v174_v7 = vshrl.u32 %v173_v6, 7  ;;  %v212_v8 = vand.u32 127, %v173_v6  ;;  %v171_v11 = vunpack.c.l.s4 %v396_v10  ;;  %v226_v20 = vld [vmem:[#allocation9] sm:$0xff]  ;;  %v185_v21 = vld [vmem:[#allocation7] sm:$0xff] }
  0x28   :  { %283 = vmatprep.subr.mxu0 %v394_v0  ;;  %v227_v24 = vld [vmem:[#allocation9 + $0x8] sm:$0xff]  ;;  %v186_v25 = vld [vmem:[#allocation7 + $0x8] sm:$0xff]  ;;  %s397_s10 = smov [#allocation10]   ;;  %vm221_vm3 = vcmask 1041409   ;;  %vm224_vm4 = vcmask 58368  }
  0x29   :  { %v215_v9 = vsub.s32 %v212_v8, %v174_v7  ;;  %v172_v13 = vunpack.c.0.s8 %v171_v11  ;;  %v189_v16 = vsub.s32 0, %v174_v7  ;;  %s257_s11 = sshll.u32 %s397_s10, 4  ;;  %s258_s11 = int_to_ptr.vmem [resolvable:$true] %s257_s11 }
  0x2a   :  { %s363_s4 = scalar_lea.vmem %s258_s11, 64  ;;  %p368_p2 = scmp.lt.s32.totalorder %s258_s11, %s258_s11 }
  0x2b   :  { %284 = vmatpush3.xpose.msk.msra.mxu0 %vm72_vm1, %v70_v2  ;;  %v175_v15 = vsub.s32 %v172_v13, %v174_v7  ;;  %p364_p1 = scmp.ne.s32.totalorder %s258_s11, %s363_s4  ;;  %p369_p3 = scmp.lt.s32.totalorder %s363_s4, %s363_s4 }
  0x2c   :  { %285 = vmatprep.subr.mxu0 %v394_v0 }
  0x2d   :  { %p370_p4 = por %p369_p3, %p368_p2 }
  0x2f   :  { %286 = vmatpush3.xpose.msk.msra.mxu0 %vm72_vm1, %v69_v3  ;;  %p371_p5 = pnand %p370_p4, %p364_p1 }
  0x30   :  { %287 = vmatprep.subr.mxu0 %v394_v0 }
  0x33   :  { %288 = vmatpush3.xpose.msk.msra.mxu0 %vm72_vm1, %v68_v4 }
  0x36   :  { %290 = vmatmul.mubr.msk.f32.vlgmr.msra.gmra.mxu0 %vm72_vm1, %v67_v5 }
  0xf6   :  { %v154_v12 = vpop.f32.mrf.mxu0 }
  0xf7   :  { %159 = vst.msk [vmem:[#allocation2] sm:$0x3] %vm158_vm2, %v154_v12 }
  0xf8   :  { %v291_v14 = vpop.f32.mrf.mxu0 }
  0xfe   :  { %v275_v17 = vld.sshfl [vmem:[#allocation2] sm:$0x11 pattern:$0x75316420] }
  0xff   :  { %v176_v18 = vrot.slane %v275_v17, %v175_v15  ;;  %v169_v19 = vcombine.high %v275_v17, %v275_v17 }
 0x101   :  { %v190_v22 = vrot.slane %v176_v18, %v189_v16  ;;  %v183_v23 = vrot.slane %v169_v19, %v175_v15 }
 0x103   :  { %v228_v26 = vmul.f32 %v226_v20, %v190_v22  ;;  %v197_v27 = vmul.f32 %v190_v22, %v185_v21  ;;  %v194_v28 = vrot.slane %v183_v23, %v189_v16 }
 0x105   :  { %v230_v29 = vsel %vm72_vm1, %v228_v26, 0.0  ;;  %v200_v30 = vsel %vm72_vm1, %v197_v27, 0.0  ;;  %v229_v31 = vmul.f32 %v227_v24, %v194_v28  ;;  %v198_v32 = vmul.f32 %v194_v28, %v186_v25 }
 0x106   :  { %231 = vadd.xlane.f32.xlu1 %v230_v29  ;;  %201 = vadd.xlane.f32.xlu0 %v200_v30 }
 0x107   :  { %v233_v33 = vsel %vm72_vm1, %v229_v31, 0.0  ;;  %v203_v34 = vsel %vm72_vm1, %v198_v32, 0.0 }
 0x10a   :  { %234 = vadd.xlane.f32.xlu1 %v233_v33  ;;  %204 = vadd.xlane.f32.xlu0 %v203_v34 }
 0x18f   :  { %v232_v36 = vpop.xlane.xlu1 %231  ;;  %v202_v37 = vpop.xlane.xlu0 %201 }
 0x190   :  { %v236_v38 = vadd.f32 %v232_v36, %v206_v35  ;;  %v207_v39 = vadd.f32 %v206_v35, %v202_v37 }
 0x192   :  { %v243_v44 = vrot.slane %v236_v38, %v215_v9  ;;  %v216_v45 = vrot.slane %v207_v39, %v215_v9 }
 0x193   :  { %v235_v40 = vpop.xlane.xlu1 %234  ;;  %v205_v41 = vpop.xlane.xlu0 %204 }
 0x194   :  { %v237_v42 = vadd.f32 %v235_v40, %v206_v35  ;;  %v208_v43 = vadd.f32 %v206_v35, %v205_v41 }
 0x196   :  { %v247_v46 = vrot.slane %v237_v42, %v215_v9  ;;  %v220_v47 = vrot.slane %v208_v43, %v215_v9 }
 0x198   :  { %v248_v48 = vsel %vm221_vm3, %v247_v46, %v243_v44  ;;  %v222_v49 = vsel %vm221_vm3, %v220_v47, %v216_v45 }
 0x199   :  { %225 = vst.msk [vmem:[#allocation10] sm:$0x3] %vm224_vm4, %v222_v49  ;;  %251 = vst.msk [vmem:[#allocation10 + $0x2] sm:$0x3] %vm224_vm4, %v248_v48 }
 0x19a   :  { %374 = shalt.err (!%p371_p5)
}
 0x19b   :  { %s398_s12 = smov 32   ;;  %s399_s13 = smov 2  }
 0x19c   :  { %263 = dma.vmem_to_hbm [thread:$0]  %s258_s11, 64, %s462_s5, [#allocation6], %s398_s12, %s398_s12, %s399_s13  }
 0x19d   :  { %387 = dma.done.wait [#allocation6], 64  }
 0x19e   :  { %388 = vsyncadd [#allocation6], 4294967232 }
 0x19f   :  { %267 = vsyncpa [#allocation5], 1 }
 0x1a0   :  { %268 = vsyncpa [#allocation8], 1 }
 0x1a1   :  { %269 = vsyncpa [#allocation6], 1 }

</bundles_post_ra>
